<compile_context>
chip_gen: v7x
topology: tpu7x:2x2x1
jax: 0.10.0
libtpu: 0.0.40
codegen_flags: <defaults>
</compile_context>

<pallas_src>
import functools

import jax
import jax.numpy as jnp
from jax.experimental import pallas as pl
from jax.experimental.pallas import tpu as pltpu


def _decomp_kernel(x_ref, res_ref, mean_ref, xpad_ref, *, kernel_size: int):
    """One (batch-tile, channel-tile) block per grid step.

    x_ref    : (bt, L, Ct)                 original series block
    res_ref  : (bt, L, Ct)                 x - moving_mean
    mean_ref : (bt, L, Ct)                 moving_mean
    xpad_ref : (bt, L + 2*pad, Ct) f32     VMEM scratch (replicate-padded)
    """
    bt, L, C = x_ref.shape
    pad = (kernel_size - 1) // 2
    Lp = L + 2 * pad

    xb = x_ref[...].astype(jnp.float32)

    # Build the replicate-padded series in VMEM (never materialized in HBM).
    xpad_ref[:, pad:pad + L, :] = xb
    if pad > 0:
        xpad_ref[:, 0:pad, :] = jnp.broadcast_to(xb[:, 0:1, :], (bt, pad, C))
        xpad_ref[:, pad + L:Lp, :] = jnp.broadcast_to(
            xb[:, L - 1:L, :], (bt, pad, C))
    xpad = xpad_ref[...]

    # Windowed sum of length kernel_size via a shift-and-add doubling tree:
    # p_arr[t] holds run-sums of length p starting at t; acc accumulates the
    # binary decomposition of kernel_size. ~2*log2(k) adds instead of k-1.
    p_arr, p = xpad, 1
    acc, c = None, 0
    rem = kernel_size
    while True:
        if rem & 1:
            if acc is None:
                acc, c = p_arr, p
            else:
                cnt = Lp - (c + p) + 1
                acc = acc[:, :cnt, :] + p_arr[:, c:c + cnt, :]
                c += p
        rem >>= 1
        if rem == 0:
            break
        cnt = Lp - 2 * p + 1
        p_arr = p_arr[:, :cnt, :] + p_arr[:, p:p + cnt, :]
        p *= 2

    win = acc[:, :L, :]  # final valid count is exactly L
    mean = win * (1.0 / kernel_size)
    mean_ref[...] = mean.astype(mean_ref.dtype)
    res_ref[...] = (xb - mean).astype(res_ref.dtype)


def series_decomp(x: jax.Array, kernel_size: int):
    """Equivalent of series_decomp(kernel_size).forward(x) with x: (B, L, C).

    Returns (res, moving_mean), both of shape (B, L, C).
    """
    assert kernel_size % 2 == 1, "series_decomp expects an odd kernel_size"
    B, L, C = x.shape
    pad = (kernel_size - 1) // 2
    itemsize = jnp.dtype(x.dtype).itemsize

    # --- channel tiling (only when C is a large multiple of 128, so the
    #     (8, 128) block constraint is always satisfied) ---------------------
    c_tile = C
    if C % 128 == 0 and C > 512:
        for t in (512, 256, 128):
            if C % t == 0:
                c_tile = t
                break

    # --- batch tiling: target ~1 MiB input blocks; keep blocks big for tiny
    #     problems, but expose >=2 grid steps for dual-TC chips when there is
    #     enough total work for the per-step overhead to be negligible -------
    target_block_bytes = 1 << 20
    per_b = L * c_tile * itemsize
    max_bt = max(1, target_block_bytes // per_b)
    total_bytes = B * L * C * itemsize
    if B >= 2 and total_bytes >= (4 << 20):
        max_bt = min(max_bt, max(1, B // 2))
    bt = next(cand for cand in range(min(B, max_bt), 0, -1) if B % cand == 0)

    grid = (B // bt, C // c_tile)
    block = (bt, L, c_tile)

    kernel = functools.partial(_decomp_kernel, kernel_size=kernel_size)

    res, mean = pl.pallas_call(
        kernel,
        out_shape=(
            jax.ShapeDtypeStruct((B, L, C), x.dtype),
            jax.ShapeDtypeStruct((B, L, C), x.dtype),
        ),
        grid_spec=pltpu.PrefetchScalarGridSpec(
            num_scalar_prefetch=0,
            grid=grid,
            in_specs=[
                pl.BlockSpec(block, lambda b, c: (b, 0, c)),
            ],
            out_specs=[
                pl.BlockSpec(block, lambda b, c: (b, 0, c)),
                pl.BlockSpec(block, lambda b, c: (b, 0, c)),
            ],
            scratch_shapes=[
                pltpu.VMEM((bt, L + 2 * pad, c_tile), jnp.float32),
            ],
        ),
        compiler_params=pltpu.CompilerParams(
            dimension_semantics=("parallel", "parallel")),
    )(x)
    return res, mean


def _reference(x, kernel_size):
    """Pure-JAX reference matching the PyTorch semantics."""
    pad = (kernel_size - 1) // 2
    front = jnp.repeat(x[:, 0:1, :], pad, axis=1)
    end = jnp.repeat(x[:, -1:, :], pad, axis=1)
    xpad = jnp.concatenate([front, x, end], axis=1)
    L = x.shape[1]
    windows = jnp.stack([xpad[:, j:j + L, :] for j in range(kernel_size)], 0)
    mean = jnp.mean(windows, axis=0)
    return x - mean, mean


if __name__ == "__main__":
    kernel_size = 5
    B, L, C = 2, 16, 8
    key = jax.random.PRNGKey(0)
    x = jax.random.normal(key, (B, L, C), dtype=jnp.float32)

    res, mean = series_decomp(x, kernel_size)
    jax.block_until_ready((res, mean))

    res_ref, mean_ref = _reference(x, kernel_size)
    assert jnp.allclose(res, res_ref, atol=1e-5, rtol=1e-5)
    assert jnp.allclose(mean, mean_ref, atol=1e-5, rtol=1e-5)

    print("KERNEL_OK")
</pallas_src>

<mosaic_0001>
module attributes {stable_mosaic.version = 11 : i64} {
  func.func @_decomp_kernel(%arg0: i32, %arg1: i32, %arg2: memref<2x16x8xf32, #tpu.memory_space<vmem>>, %arg3: memref<2x16x8xf32, #tpu.memory_space<vmem>>, %arg4: memref<2x16x8xf32, #tpu.memory_space<vmem>>, %arg5: memref<2x20x8xf32, #tpu.memory_space<vmem>>) attributes {dimension_semantics = [#tpu.dimension_semantics<parallel>, #tpu.dimension_semantics<parallel>], iteration_bounds = array<i64: 1, 1>, scalar_prefetch = 0 : i64, scratch_operands = 1 : i64, tpu.core_type = #tpu.core_type<tc>, window_params = [{transform_indices = @transform_0, window_bounds = array<i64: 2, 16, 8>}, {transform_indices = @transform_1, window_bounds = array<i64: 2, 16, 8>}, {transform_indices = @transform_2, window_bounds = array<i64: 2, 16, 8>}]} {
    %c0 = arith.constant 0 : index
    %c0_0 = arith.constant 0 : index
    %c0_1 = arith.constant 0 : index
    %0 = vector.load %arg2[%c0, %c0_0, %c0_1] : memref<2x16x8xf32, #tpu.memory_space<vmem>>, vector<2x16x8xf32>
    %c0_2 = arith.constant 0 : index
    %c2 = arith.constant 2 : index
    %c0_3 = arith.constant 0 : index
    %1 = vector.load %arg5[%c0_2, %c2, %c0_3] : memref<2x20x8xf32, #tpu.memory_space<vmem>>, vector<2x16x8xf32>
    tpu.vector_store %arg5[%c0_2, %c2, %c0_3], %0 {strides = array<i32>} : memref<2x20x8xf32, #tpu.memory_space<vmem>>, vector<2x16x8xf32>,
    %2 = vector.extract_strided_slice %0 {offsets = [0, 0, 0], sizes = [2, 1, 8], strides = [1, 1, 1]} : vector<2x16x8xf32> to vector<2x1x8xf32>
    %3 = vector.shape_cast %2 : vector<2x1x8xf32> to vector<2x1x8xf32>
    %4 = vector.broadcast %3 : vector<2x1x8xf32> to vector<2x2x8xf32>
    %c0_4 = arith.constant 0 : index
    %c0_5 = arith.constant 0 : index
    %c0_6 = arith.constant 0 : index
    %5 = vector.load %arg5[%c0_4, %c0_5, %c0_6] : memref<2x20x8xf32, #tpu.memory_space<vmem>>, vector<2x2x8xf32>
    tpu.vector_store %arg5[%c0_4, %c0_5, %c0_6], %4 {strides = array<i32>} : memref<2x20x8xf32, #tpu.memory_space<vmem>>, vector<2x2x8xf32>,
    %6 = vector.extract_strided_slice %0 {offsets = [0, 15, 0], sizes = [2, 1, 8], strides = [1, 1, 1]} : vector<2x16x8xf32> to vector<2x1x8xf32>
    %7 = vector.shape_cast %6 : vector<2x1x8xf32> to vector<2x1x8xf32>
    %8 = vector.broadcast %7 : vector<2x1x8xf32> to vector<2x2x8xf32>
    %c0_7 = arith.constant 0 : index
    %c18 = arith.constant 18 : index
    %c0_8 = arith.constant 0 : index
    %9 = vector.load %arg5[%c0_7, %c18, %c0_8] : memref<2x20x8xf32, #tpu.memory_space<vmem>>, vector<2x2x8xf32>
    tpu.vector_store %arg5[%c0_7, %c18, %c0_8], %8 {strides = array<i32>} : memref<2x20x8xf32, #tpu.memory_space<vmem>>, vector<2x2x8xf32>,
    %c0_9 = arith.constant 0 : index
    %c0_10 = arith.constant 0 : index
    %c0_11 = arith.constant 0 : index
    %10 = vector.load %arg5[%c0_9, %c0_10, %c0_11] : memref<2x20x8xf32, #tpu.memory_space<vmem>>, vector<2x20x8xf32>
    %11 = vector.extract_strided_slice %10 {offsets = [0, 0, 0], sizes = [2, 19, 8], strides = [1, 1, 1]} : vector<2x20x8xf32> to vector<2x19x8xf32>
    %12 = vector.extract_strided_slice %10 {offsets = [0, 1, 0], sizes = [2, 19, 8], strides = [1, 1, 1]} : vector<2x20x8xf32> to vector<2x19x8xf32>
    %13 = arith.addf %11, %12 : vector<2x19x8xf32>
    %14 = vector.extract_strided_slice %13 {offsets = [0, 0, 0], sizes = [2, 17, 8], strides = [1, 1, 1]} : vector<2x19x8xf32> to vector<2x17x8xf32>
    %15 = vector.extract_strided_slice %13 {offsets = [0, 2, 0], sizes = [2, 17, 8], strides = [1, 1, 1]} : vector<2x19x8xf32> to vector<2x17x8xf32>
    %16 = arith.addf %14, %15 : vector<2x17x8xf32>
    %17 = vector.extract_strided_slice %10 {offsets = [0, 0, 0], sizes = [2, 16, 8], strides = [1, 1, 1]} : vector<2x20x8xf32> to vector<2x16x8xf32>
    %18 = vector.extract_strided_slice %16 {offsets = [0, 1, 0], sizes = [2, 16, 8], strides = [1, 1, 1]} : vector<2x17x8xf32> to vector<2x16x8xf32>
    %19 = arith.addf %17, %18 : vector<2x16x8xf32>
    %cst = arith.constant 2.000000e-01 : f32
    %20 = vector.broadcast %cst : f32 to vector<2x16x8xf32>
    %21 = arith.mulf %19, %20 : vector<2x16x8xf32>
    %c0_12 = arith.constant 0 : index
    %c0_13 = arith.constant 0 : index
    %c0_14 = arith.constant 0 : index
    %22 = vector.load %arg4[%c0_12, %c0_13, %c0_14] : memref<2x16x8xf32, #tpu.memory_space<vmem>>, vector<2x16x8xf32>
    tpu.vector_store %arg4[%c0_12, %c0_13, %c0_14], %21 {strides = array<i32>} : memref<2x16x8xf32, #tpu.memory_space<vmem>>, vector<2x16x8xf32>,
    %23 = arith.subf %0, %21 : vector<2x16x8xf32>
    %c0_15 = arith.constant 0 : index
    %c0_16 = arith.constant 0 : index
    %c0_17 = arith.constant 0 : index
    %24 = vector.load %arg3[%c0_15, %c0_16, %c0_17] : memref<2x16x8xf32, #tpu.memory_space<vmem>>, vector<2x16x8xf32>
    tpu.vector_store %arg3[%c0_15, %c0_16, %c0_17], %23 {strides = array<i32>} : memref<2x16x8xf32, #tpu.memory_space<vmem>>, vector<2x16x8xf32>,
    return
  }
  func.func @transform_0(%arg0: i32, %arg1: i32) -> (i32, i32, i32) {
    %c0_i32 = arith.constant 0 : i32
    %c0_i32_0 = arith.constant 0 : i32
    return %arg0, %c0_i32, %arg1 : i32, i32, i32
  }
  func.func @transform_1(%arg0: i32, %arg1: i32) -> (i32, i32, i32) {
    %c0_i32 = arith.constant 0 : i32
    %c0_i32_0 = arith.constant 0 : i32
    return %arg0, %c0_i32, %arg1 : i32, i32, i32
  }
  func.func @transform_2(%arg0: i32, %arg1: i32) -> (i32, i32, i32) {
    %c0_i32 = arith.constant 0 : i32
    %c0_i32_0 = arith.constant 0 : i32
    return %arg0, %c0_i32, %arg1 : i32, i32, i32
  }
}

</mosaic_0001>

<bundles_post_ra>
// kernel: tpu_custom_call.1
= control target key start
LH: loop header
LB: loop body
LE: loop exit
PB: predicated region body
PF: predicated region fallthrough
CT: control target
= control target key end

     0   :  { %vm14_vm0 = vcmask 64512   ;;  %v19_v0 = vlaneseq  ;;  %vm27_vm1 = vcmask 58368   ;;  %vm52_vm2 = vcmask 1046528   ;;  %s243_s0 = inlined_call_operand.vmem [shape: f32[2,16,8], index: 0, kind: input, shape index: {}]   ;;  %s244_s2 = inlined_call_operand.vmem [shape: f32[2,16,8], index: 2, kind: output, shape index: {1}]   ;;  %s245_s1 = inlined_call_operand.vmem [shape: f32[2,16,8], index: 1, kind: output, shape index: {0}]  }
   0x1   :  { %v170_v1 = vld [vmem:[%s243_s0] sm:$0xff]  ;;  %v175_v2 = vld [vmem:[%s243_s0 + $0x8] sm:$0xff]  ;;  %v180_v3 = vld [vmem:[%s243_s0 + $0x10] sm:$0xff]  ;;  %vm81_vm3 = vcmask 1045504  }
   0x2   :  { %15 = vst.msk [vmem:[#allocation2 + $0x2] sm:$0xff] %vm14_vm0, %v170_v1  ;;  %16 = vst.msk [vmem:[#allocation2 + $0xa] sm:$0xff] %vm14_vm0, %v175_v2  ;;  %v191_v4 = vld [vmem:[%s243_s0 + $0x18] sm:$0xff]  ;;  %v20_v5 = vshrl.u32 %v19_v0, 7 }
   0x3   :  { %17 = vst.msk [vmem:[#allocation2 + $0x1a] sm:$0xff] %vm14_vm0, %v180_v3  ;;  %18 = vst.msk [vmem:[#allocation2 + $0x22] sm:$0xff] %vm14_vm0, %v191_v4 }
   0x4   :  { %v21_v6 = vsub.s32 0, %v20_v5  ;;  %v32_v7 = vsub.s32 7, %v20_v5 }
   0x6   :  { %v22_v8 = vrot.slane %v170_v1, %v21_v6  ;;  %v26_v9 = vrot.slane %v180_v3, %v21_v6  ;;  %v33_v10 = vrot.slane %v175_v2, %v32_v7  ;;  %v37_v11 = vrot.slane %v191_v4, %v32_v7 }
   0x8   :  { %28 = vst.msk [vmem:[#allocation2] sm:$0x3] %vm27_vm1, %v22_v8  ;;  %29 = vst.msk [vmem:[#allocation2 + $0x18] sm:$0x3] %vm27_vm1, %v26_v9 }
   0x9   :  { %38 = vst.msk [vmem:[#allocation2 + $0x12] sm:$0x3] %vm27_vm1, %v33_v10  ;;  %39 = vst.msk [vmem:[#allocation2 + $0x2a] sm:$0x3] %vm27_vm1, %v37_v11  ;;  %v41_v12 = vld [vmem:[#allocation2 + $0x8] sm:$0xff] }
   0xa   :  { %v44_v13 = vld [vmem:[#allocation2 + $0x20] sm:$0xff]  ;;  %v54_v14 = vrot.slane %v41_v12, 1 }
   0xb   :  { %v59_v15 = vrot.slane %v44_v13, 1 }
   0xf   :  { %v40_v16 = vld [vmem:[#allocation2] sm:$0xff]  ;;  %v43_v18 = vld [vmem:[#allocation2 + $0x18] sm:$0xff] }
  0x10   :  { %v42_v17 = vld [vmem:[#allocation2 + $0x10] sm:$0xf]  ;;  %v53_v19 = vrot.slane %v40_v16, 1  ;;  %v45_v21 = vld [vmem:[#allocation2 + $0x28] sm:$0xf]  ;;  %v58_v22 = vrot.slane %v43_v18, 1 }
  0x11   :  { %v56_v20 = vrot.slane %v42_v17, 1  ;;  %v61_v23 = vrot.slane %v45_v21, 1 }
  0x12   :  { %v55_v24 = vsel %vm52_vm2, %v53_v19, %v54_v14  ;;  %v60_v27 = vsel %vm52_vm2, %v58_v22, %v59_v15 }
  0x13   :  { %v57_v25 = vsel %vm52_vm2, %v54_v14, %v56_v20  ;;  %v71_v26 = vadd.f32 %v56_v20, %v42_v17  ;;  %v69_v28 = vadd.f32 %v55_v24, %v40_v16  ;;  %v62_v30 = vsel %vm52_vm2, %v59_v15, %v61_v23 }
  0x14   :  { %v70_v29 = vadd.f32 %v57_v25, %v41_v12  ;;  %v72_v31 = vadd.f32 %v60_v27, %v43_v18  ;;  %v73_v33 = vadd.f32 %v62_v30, %v44_v13  ;;  %v74_v34 = vadd.f32 %v61_v23, %v45_v21 }
  0x15   :  { %v85_v32 = vrot.slane %v71_v26, 2  ;;  %v82_v35 = vrot.slane %v69_v28, 2 }
  0x16   :  { %v83_v36 = vrot.slane %v70_v29, 2  ;;  %v87_v37 = vrot.slane %v72_v31, 2  ;;  %v88_v39 = vrot.slane %v73_v33, 2  ;;  %v90_v40 = vrot.slane %v74_v34, 2 }
  0x17   :  { %v100_v38 = vadd.f32 %v85_v32, %v71_v26 }
  0x18   :  { %v84_v41 = vsel %vm81_vm3, %v82_v35, %v83_v36  ;;  %v86_v42 = vsel %vm81_vm3, %v83_v36, %v85_v32  ;;  %v89_v45 = vsel %vm81_vm3, %v87_v37, %v88_v39  ;;  %v91_v46 = vsel %vm81_vm3, %v88_v39, %v90_v40 }
  0x19   :  { %v98_v43 = vadd.f32 %v84_v41, %v69_v28  ;;  %v99_v44 = vadd.f32 %v86_v42, %v70_v29  ;;  %v101_v47 = vadd.f32 %v89_v45, %v72_v31  ;;  %v103_v48 = vadd.f32 %v90_v40, %v74_v34 }
  0x1a   :  { %v113_v51 = vrot.slane %v100_v38, 1  ;;  %v102_v52 = vadd.f32 %v91_v46, %v73_v33 }
  0x1b   :  { %v110_v49 = vrot.slane %v98_v43, 1  ;;  %v111_v50 = vrot.slane %v99_v44, 1  ;;  %v115_v53 = vrot.slane %v101_v47, 1  ;;  %v118_v57 = vrot.slane %v103_v48, 1 }
  0x1c   :  { %v116_v56 = vrot.slane %v102_v52, 1 }
  0x1d   :  { %v112_v54 = vsel %vm52_vm2, %v110_v49, %v111_v50  ;;  %v114_v55 = vsel %vm52_vm2, %v111_v50, %v113_v51 }
  0x1e   :  { %v124_v58 = vadd.f32 %v112_v54, %v40_v16  ;;  %v125_v59 = vadd.f32 %v114_v55, %v41_v12  ;;  %v117_v60 = vsel %vm52_vm2, %v115_v53, %v116_v56  ;;  %v119_v61 = vsel %vm52_vm2, %v116_v56, %v118_v57 }
  0x1f   :  { %v126_v0 = vadd.f32 %v117_v60, %v43_v18  ;;  %v127_v5 = vadd.f32 %v119_v61, %v44_v13 }
  0x20   :  { %v128_v62 = vmul.f32 0.2, %v124_v58  ;;  %v129_v63 = vmul.f32 0.2, %v125_v59 }
  0x21   :  { %v130_v6 = vmul.f32 0.2, %v126_v0  ;;  %v131_v7 = vmul.f32 0.2, %v127_v5 }
  0x22   :  { %132 = vst.msk [vmem:[%s244_s2] sm:$0xff] %vm14_vm0, %v128_v62  ;;  %133 = vst.msk [vmem:[%s244_s2 + $0x8] sm:$0xff] %vm14_vm0, %v129_v63  ;;  %v136_v8 = vsub.f32 %v170_v1, %v128_v62  ;;  %v137_v9 = vsub.f32 %v175_v2, %v129_v63 }
  0x23   :  { %134 = vst.msk [vmem:[%s244_s2 + $0x10] sm:$0xff] %vm14_vm0, %v130_v6  ;;  %135 = vst.msk [vmem:[%s244_s2 + $0x18] sm:$0xff] %vm14_vm0, %v131_v7  ;;  %v138_v1 = vsub.f32 %v180_v3, %v130_v6  ;;  %v139_v2 = vsub.f32 %v191_v4, %v131_v7 }
  0x24   :  { %140 = vst.msk [vmem:[%s245_s1] sm:$0xff] %vm14_vm0, %v136_v8  ;;  %141 = vst.msk [vmem:[%s245_s1 + $0x8] sm:$0xff] %vm14_vm0, %v137_v9 }
  0x25   :  { %142 = vst.msk [vmem:[%s245_s1 + $0x10] sm:$0xff] %vm14_vm0, %v138_v1  ;;  %143 = vst.msk [vmem:[%s245_s1 + $0x18] sm:$0xff] %vm14_vm0, %v139_v2 }

</bundles_post_ra>
